<compile_context>
chip_gen: v5e
topology: v5e:2x2
jax: 0.10.0
libtpu: 0.0.40
codegen_flags: <defaults>
</compile_context>

<pallas_src>
import jax
import jax.numpy as jnp
from jax.experimental import pallas as pl
from jax.experimental.pallas import tpu as pltpu

EPS = 1e-8


def _round_up(x, m):
    return ((x + m - 1) // m) * m


def _nerf_pose_kernel(v_ref, alpha_ref, t_ref, k_ref):
    # v_ref:(3,TS,128)  alpha_ref:(1,TS,128)  t_ref:(3,TS,128)  k_ref:(12,TS,128)
    vx = v_ref[0]            # (TS, 128) -- dense sublanes + lanes
    vy = v_ref[1]
    vz = v_ref[2]
    alpha = alpha_ref[0]     # (TS, 128)

    # normalize rotation axis: v / (||v|| + eps)  (exact, matches reference)
    norm = jnp.sqrt(vx * vx + vy * vy + vz * vz)
    inv = pl.reciprocal(norm + EPS, approx=False)
    vx = vx * inv
    vy = vy * inv
    vz = vz * inv

    s = jnp.sin(alpha)            # EUP
    c1 = 1.0 - jnp.cos(alpha)     # EUP

    vx2 = vx * vx
    vy2 = vy * vy
    vz2 = vz * vz
    vxy = vx * vy
    vxz = vx * vz
    vyz = vy * vz

    one = jnp.ones_like(vx)

    # R = I + S*sin(alpha) + S@S*(1 - cos(alpha)),  S = skew(v)
    # K rows 0..11 flattened row-major: [r00 r01 r02 tx | r10 r11 r12 ty | r20 r21 r22 tz]
    k_ref[0] = one - c1 * (vy2 + vz2)       # r00
    k_ref[1] = c1 * vxy - s * vz            # r01
    k_ref[2] = s * vy + c1 * vxz            # r02
    k_ref[3] = t_ref[0]                     # tx
    k_ref[4] = s * vz + c1 * vxy            # r10
    k_ref[5] = one - c1 * (vx2 + vz2)       # r11
    k_ref[6] = c1 * vyz - s * vx            # r12
    k_ref[7] = t_ref[1]                     # ty
    k_ref[8] = c1 * vxz - s * vy            # r20
    k_ref[9] = s * vx + c1 * vyz            # r21
    k_ref[10] = one - c1 * (vx2 + vy2)      # r22
    k_ref[11] = t_ref[2]                    # tz


def nerf_pose_forward(image_idx, v_table, alpha_table, t_table, camera_table,
                      *, tile_n=8192):
    """Pallas implementation of Nerf_pose.forward.

    Returns (K, camera) with K: (N, 4, 4) float32, camera: (4,) float32.
    """
    n = image_idx.shape[0]

    # Effective tile: multiple of 1024 poses (=> sublane-group count multiple of 8).
    tile_n = _round_up(max(tile_n, 1024), 1024)
    tile_eff = min(tile_n, _round_up(n, 1024))
    n_pad = _round_up(n, tile_eff)
    pad = n_pad - n

    # Fold padding into the index vector (pads with 0 -> valid table row, no inf/nan),
    # and gather from the pre-transposed tiny tables so we emit (rows, Npad) directly
    # (no N-sized transpose / pad passes over the gathered data).
    idx_pad = jnp.pad(image_idx, (0, pad))
    vt = jnp.take(v_table.astype(jnp.float32).T, idx_pad, axis=1)        # (3, Npad)
    at = jnp.take(alpha_table.astype(jnp.float32).T, idx_pad, axis=1)    # (1, Npad)
    tt = jnp.take(t_table.astype(jnp.float32).T, idx_pad, axis=1)        # (3, Npad)

    g = n_pad // 128          # total 128-lane groups
    ts = tile_eff // 128      # sublane-groups per grid step (multiple of 8, or == g)

    # metadata-only reshapes to the sublane-dense 3-D layout
    vt3 = vt.reshape(3, g, 128)
    at3 = at.reshape(1, g, 128)
    tt3 = tt.reshape(3, g, 128)

    k12 = pl.pallas_call(
        _nerf_pose_kernel,
        out_shape=jax.ShapeDtypeStruct((12, g, 128), jnp.float32),
        grid=(g // ts,),
        in_specs=[
            pl.BlockSpec((3, ts, 128), lambda i: (0, i, 0)),
            pl.BlockSpec((1, ts, 128), lambda i: (0, i, 0)),
            pl.BlockSpec((3, ts, 128), lambda i: (0, i, 0)),
        ],
        out_specs=pl.BlockSpec((12, ts, 128), lambda i: (0, i, 0)),
        compiler_params=pltpu.CompilerParams(
            dimension_semantics=("parallel",)),
    )(vt3, at3, tt3)

    # (12, g, 128) -> (12, Npad) -> (N, 12), append constant [0,0,0,1] row -> (N, 4, 4).
    # TODO(synk): if the downstream consumer accepts K as (12, N) / (16, N), return that
    # layout directly and skip this transpose pass entirely.
    k12 = k12.reshape(12, n_pad)[:, :n].T                              # (N, 12)
    bottom = jnp.broadcast_to(
        jnp.array([0.0, 0.0, 0.0, 1.0], dtype=jnp.float32), (n, 4))
    K = jnp.concatenate([k12, bottom], axis=1).reshape(n, 4, 4)

    cam = camera_table[0]  # self.camera(torch.tensor(0)) -> (4,)
    return K, cam


def _reference_forward(image_idx, v_table, alpha_table, t_table, camera_table):
    """Pure-JAX mirror of the PyTorch module, for correctness check."""
    v = jnp.take(v_table, image_idx, axis=0)
    v = v / (jnp.linalg.norm(v, axis=-1, keepdims=True) + EPS)
    alpha = jnp.take(alpha_table, image_idx, axis=0)
    t = jnp.take(t_table, image_idx, axis=0)

    mapping = jnp.array(
        [[[0.0, 0.0, 0.0], [0.0, 0.0, -1.0], [0.0, 1.0, 0.0]],
         [[0.0, 0.0, 1.0], [0.0, 0.0, 0.0], [-1.0, 0.0, 0.0]],
         [[0.0, -1.0, 0.0], [1.0, 0.0, 0.0], [0.0, 0.0, 0.0]]],
        dtype=jnp.float32)
    skew = jnp.sum(mapping[None, :, :, :] * v[:, None, None, :], axis=-1)
    rot = (jnp.eye(3, dtype=jnp.float32)[None]
           + skew * jnp.sin(alpha)[:, :, None]
           + jnp.matmul(skew, skew) * (1.0 - jnp.cos(alpha))[:, :, None])
    n = rot.shape[0]
    K = jnp.tile(jnp.eye(4, dtype=jnp.float32)[None], (n, 1, 1))
    K = K.at[:, 0:3, 0:3].set(rot)
    K = K.at[:, 0:3, 3].set(t)
    return K, camera_table[0]


if __name__ == "__main__":
    key = jax.random.PRNGKey(0)
    k1, k2, k3, k4, k5 = jax.random.split(key, 5)

    maximum_pose = 16   # small synthetic table (module default is 1000)
    n_idx = 8

    # nn.Embedding default init ~ N(0, 1); deterministic synthetic weights.
    v_table = jax.random.normal(k1, (maximum_pose, 3), dtype=jnp.float32)
    alpha_table = jax.random.normal(k2, (maximum_pose, 1), dtype=jnp.float32)
    t_table = jax.random.normal(k3, (maximum_pose, 3), dtype=jnp.float32)
    camera_table = jax.random.normal(k4, (1, 4), dtype=jnp.float32)

    image_idx = jax.random.randint(k5, (n_idx,), 0, maximum_pose, dtype=jnp.int32)

    K, cam = nerf_pose_forward(image_idx, v_table, alpha_table, t_table, camera_table)
    (K, cam) = jax.block_until_ready((K, cam))

    K_ref, cam_ref = _reference_forward(image_idx, v_table, alpha_table, t_table,
                                        camera_table)
    assert K.shape == (n_idx, 4, 4) and cam.shape == (4,)
    assert jnp.allclose(K, K_ref, atol=1e-5, rtol=1e-5)
    assert jnp.allclose(cam, cam_ref, atol=1e-6)

    print("KERNEL_OK")
</pallas_src>

<mosaic_0001>
module attributes {stable_mosaic.version = 11 : i64} {
  func.func @_nerf_pose_kernel(%arg0: i32, %arg1: memref<3x8x128xf32, #tpu.memory_space<vmem>>, %arg2: memref<1x8x128xf32, #tpu.memory_space<vmem>>, %arg3: memref<3x8x128xf32, #tpu.memory_space<vmem>>, %arg4: memref<12x8x128xf32, #tpu.memory_space<vmem>>) attributes {dimension_semantics = [#tpu.dimension_semantics<parallel>], iteration_bounds = array<i64: 1>, scalar_prefetch = 0 : i64, scratch_operands = 0 : i64, tpu.core_type = #tpu.core_type<tc>, window_params = [{transform_indices = @transform_0, window_bounds = array<i64: 3, 8, 128>}, {transform_indices = @transform_1, window_bounds = array<i64: 1, 8, 128>}, {transform_indices = @transform_2, window_bounds = array<i64: 3, 8, 128>}, {transform_indices = @transform_3, window_bounds = array<i64: 12, 8, 128>}]} {
    %c0 = arith.constant 0 : index
    %c0_0 = arith.constant 0 : index
    %c0_1 = arith.constant 0 : index
    %0 = vector.load %arg1[%c0, %c0_0, %c0_1] : memref<3x8x128xf32, #tpu.memory_space<vmem>>, vector<1x8x128xf32>
    %1 = vector.shape_cast %0 : vector<1x8x128xf32> to vector<8x128xf32>
    %c1 = arith.constant 1 : index
    %c0_2 = arith.constant 0 : index
    %c0_3 = arith.constant 0 : index
    %2 = vector.load %arg1[%c1, %c0_2, %c0_3] : memref<3x8x128xf32, #tpu.memory_space<vmem>>, vector<1x8x128xf32>
    %3 = vector.shape_cast %2 : vector<1x8x128xf32> to vector<8x128xf32>
    %c2 = arith.constant 2 : index
    %c0_4 = arith.constant 0 : index
    %c0_5 = arith.constant 0 : index
    %4 = vector.load %arg1[%c2, %c0_4, %c0_5] : memref<3x8x128xf32, #tpu.memory_space<vmem>>, vector<1x8x128xf32>
    %5 = vector.shape_cast %4 : vector<1x8x128xf32> to vector<8x128xf32>
    %c0_6 = arith.constant 0 : index
    %c0_7 = arith.constant 0 : index
    %c0_8 = arith.constant 0 : index
    %6 = vector.load %arg2[%c0_6, %c0_7, %c0_8] : memref<1x8x128xf32, #tpu.memory_space<vmem>>, vector<1x8x128xf32>
    %7 = vector.shape_cast %6 : vector<1x8x128xf32> to vector<8x128xf32>
    %8 = arith.mulf %1, %1 : vector<8x128xf32>
    %9 = arith.mulf %3, %3 : vector<8x128xf32>
    %10 = arith.addf %8, %9 : vector<8x128xf32>
    %11 = arith.mulf %5, %5 : vector<8x128xf32>
    %12 = arith.addf %10, %11 : vector<8x128xf32>
    %13 = math.sqrt %12 : vector<8x128xf32>
    %cst = arith.constant 9.99999993E-9 : f32
    %14 = vector.broadcast %cst : f32 to vector<8x128xf32>
    %15 = arith.addf %13, %14 : vector<8x128xf32>
    %16 = tpu.reciprocal %15 : vector<8x128xf32> -> vector<8x128xf32>
    %17 = arith.mulf %1, %16 : vector<8x128xf32>
    %18 = arith.mulf %3, %16 : vector<8x128xf32>
    %19 = arith.mulf %5, %16 : vector<8x128xf32>
    %20 = math.sin %7 : vector<8x128xf32>
    %21 = math.cos %7 : vector<8x128xf32>
    %cst_9 = arith.constant 1.000000e+00 : f32
    %22 = vector.broadcast %cst_9 : f32 to vector<8x128xf32>
    %23 = arith.subf %22, %21 : vector<8x128xf32>
    %24 = arith.mulf %17, %17 : vector<8x128xf32>
    %25 = arith.mulf %18, %18 : vector<8x128xf32>
    %26 = arith.mulf %19, %19 : vector<8x128xf32>
    %27 = arith.mulf %17, %18 : vector<8x128xf32>
    %28 = arith.mulf %17, %19 : vector<8x128xf32>
    %29 = arith.mulf %18, %19 : vector<8x128xf32>
    %cst_10 = arith.constant 1.000000e+00 : f32
    %30 = vector.broadcast %cst_10 : f32 to vector<8x128xf32>
    %31 = arith.addf %25, %26 : vector<8x128xf32>
    %32 = arith.mulf %23, %31 : vector<8x128xf32>
    %33 = arith.subf %30, %32 : vector<8x128xf32>
    %c0_11 = arith.constant 0 : index
    %c0_12 = arith.constant 0 : index
    %c0_13 = arith.constant 0 : index
    %34 = vector.load %arg4[%c0_11, %c0_12, %c0_13] : memref<12x8x128xf32, #tpu.memory_space<vmem>>, vector<1x8x128xf32>
    %35 = vector.shape_cast %34 : vector<1x8x128xf32> to vector<8x128xf32>
    %36 = vector.shape_cast %33 : vector<8x128xf32> to vector<1x8x128xf32>
    tpu.vector_store %arg4[%c0_11, %c0_12, %c0_13], %36 {strides = array<i32>} : memref<12x8x128xf32, #tpu.memory_space<vmem>>, vector<1x8x128xf32>,
    %37 = arith.mulf %23, %27 : vector<8x128xf32>
    %38 = arith.mulf %20, %19 : vector<8x128xf32>
    %39 = arith.subf %37, %38 : vector<8x128xf32>
    %c1_14 = arith.constant 1 : index
    %c0_15 = arith.constant 0 : index
    %c0_16 = arith.constant 0 : index
    %40 = vector.load %arg4[%c1_14, %c0_15, %c0_16] : memref<12x8x128xf32, #tpu.memory_space<vmem>>, vector<1x8x128xf32>
    %41 = vector.shape_cast %40 : vector<1x8x128xf32> to vector<8x128xf32>
    %42 = vector.shape_cast %39 : vector<8x128xf32> to vector<1x8x128xf32>
    tpu.vector_store %arg4[%c1_14, %c0_15, %c0_16], %42 {strides = array<i32>} : memref<12x8x128xf32, #tpu.memory_space<vmem>>, vector<1x8x128xf32>,
    %43 = arith.mulf %20, %18 : vector<8x128xf32>
    %44 = arith.mulf %23, %28 : vector<8x128xf32>
    %45 = arith.addf %43, %44 : vector<8x128xf32>
    %c2_17 = arith.constant 2 : index
    %c0_18 = arith.constant 0 : index
    %c0_19 = arith.constant 0 : index
    %46 = vector.load %arg4[%c2_17, %c0_18, %c0_19] : memref<12x8x128xf32, #tpu.memory_space<vmem>>, vector<1x8x128xf32>
    %47 = vector.shape_cast %46 : vector<1x8x128xf32> to vector<8x128xf32>
    %48 = vector.shape_cast %45 : vector<8x128xf32> to vector<1x8x128xf32>
    tpu.vector_store %arg4[%c2_17, %c0_18, %c0_19], %48 {strides = array<i32>} : memref<12x8x128xf32, #tpu.memory_space<vmem>>, vector<1x8x128xf32>,
    %c0_20 = arith.constant 0 : index
    %c0_21 = arith.constant 0 : index
    %c0_22 = arith.constant 0 : index
    %49 = vector.load %arg3[%c0_20, %c0_21, %c0_22] : memref<3x8x128xf32, #tpu.memory_space<vmem>>, vector<1x8x128xf32>
    %50 = vector.shape_cast %49 : vector<1x8x128xf32> to vector<8x128xf32>
    %c3 = arith.constant 3 : index
    %c0_23 = arith.constant 0 : index
    %c0_24 = arith.constant 0 : index
    %51 = vector.load %arg4[%c3, %c0_23, %c0_24] : memref<12x8x128xf32, #tpu.memory_space<vmem>>, vector<1x8x128xf32>
    %52 = vector.shape_cast %51 : vector<1x8x128xf32> to vector<8x128xf32>
    %53 = vector.shape_cast %50 : vector<8x128xf32> to vector<1x8x128xf32>
    tpu.vector_store %arg4[%c3, %c0_23, %c0_24], %53 {strides = array<i32>} : memref<12x8x128xf32, #tpu.memory_space<vmem>>, vector<1x8x128xf32>,
    %54 = arith.mulf %20, %19 : vector<8x128xf32>
    %55 = arith.mulf %23, %27 : vector<8x128xf32>
    %56 = arith.addf %54, %55 : vector<8x128xf32>
    %c4 = arith.constant 4 : index
    %c0_25 = arith.constant 0 : index
    %c0_26 = arith.constant 0 : index
    %57 = vector.load %arg4[%c4, %c0_25, %c0_26] : memref<12x8x128xf32, #tpu.memory_space<vmem>>, vector<1x8x128xf32>
    %58 = vector.shape_cast %57 : vector<1x8x128xf32> to vector<8x128xf32>
    %59 = vector.shape_cast %56 : vector<8x128xf32> to vector<1x8x128xf32>
    tpu.vector_store %arg4[%c4, %c0_25, %c0_26], %59 {strides = array<i32>} : memref<12x8x128xf32, #tpu.memory_space<vmem>>, vector<1x8x128xf32>,
    %60 = arith.addf %24, %26 : vector<8x128xf32>
    %61 = arith.mulf %23, %60 : vector<8x128xf32>
    %62 = arith.subf %30, %61 : vector<8x128xf32>
    %c5 = arith.constant 5 : index
    %c0_27 = arith.constant 0 : index
    %c0_28 = arith.constant 0 : index
    %63 = vector.load %arg4[%c5, %c0_27, %c0_28] : memref<12x8x128xf32, #tpu.memory_space<vmem>>, vector<1x8x128xf32>
    %64 = vector.shape_cast %63 : vector<1x8x128xf32> to vector<8x128xf32>
    %65 = vector.shape_cast %62 : vector<8x128xf32> to vector<1x8x128xf32>
    tpu.vector_store %arg4[%c5, %c0_27, %c0_28], %65 {strides = array<i32>} : memref<12x8x128xf32, #tpu.memory_space<vmem>>, vector<1x8x128xf32>,
    %66 = arith.mulf %23, %29 : vector<8x128xf32>
    %67 = arith.mulf %20, %17 : vector<8x128xf32>
    %68 = arith.subf %66, %67 : vector<8x128xf32>
    %c6 = arith.constant 6 : index
    %c0_29 = arith.constant 0 : index
    %c0_30 = arith.constant 0 : index
    %69 = vector.load %arg4[%c6, %c0_29, %c0_30] : memref<12x8x128xf32, #tpu.memory_space<vmem>>, vector<1x8x128xf32>
    %70 = vector.shape_cast %69 : vector<1x8x128xf32> to vector<8x128xf32>
    %71 = vector.shape_cast %68 : vector<8x128xf32> to vector<1x8x128xf32>
    tpu.vector_store %arg4[%c6, %c0_29, %c0_30], %71 {strides = array<i32>} : memref<12x8x128xf32, #tpu.memory_space<vmem>>, vector<1x8x128xf32>,
    %c1_31 = arith.constant 1 : index
    %c0_32 = arith.constant 0 : index
    %c0_33 = arith.constant 0 : index
    %72 = vector.load %arg3[%c1_31, %c0_32, %c0_33] : memref<3x8x128xf32, #tpu.memory_space<vmem>>, vector<1x8x128xf32>
    %73 = vector.shape_cast %72 : vector<1x8x128xf32> to vector<8x128xf32>
    %c7 = arith.constant 7 : index
    %c0_34 = arith.constant 0 : index
    %c0_35 = arith.constant 0 : index
    %74 = vector.load %arg4[%c7, %c0_34, %c0_35] : memref<12x8x128xf32, #tpu.memory_space<vmem>>, vector<1x8x128xf32>
    %75 = vector.shape_cast %74 : vector<1x8x128xf32> to vector<8x128xf32>
    %76 = vector.shape_cast %73 : vector<8x128xf32> to vector<1x8x128xf32>
    tpu.vector_store %arg4[%c7, %c0_34, %c0_35], %76 {strides = array<i32>} : memref<12x8x128xf32, #tpu.memory_space<vmem>>, vector<1x8x128xf32>,
    %77 = arith.mulf %23, %28 : vector<8x128xf32>
    %78 = arith.mulf %20, %18 : vector<8x128xf32>
    %79 = arith.subf %77, %78 : vector<8x128xf32>
    %c8 = arith.constant 8 : index
    %c0_36 = arith.constant 0 : index
    %c0_37 = arith.constant 0 : index
    %80 = vector.load %arg4[%c8, %c0_36, %c0_37] : memref<12x8x128xf32, #tpu.memory_space<vmem>>, vector<1x8x128xf32>
    %81 = vector.shape_cast %80 : vector<1x8x128xf32> to vector<8x128xf32>
    %82 = vector.shape_cast %79 : vector<8x128xf32> to vector<1x8x128xf32>
    tpu.vector_store %arg4[%c8, %c0_36, %c0_37], %82 {strides = array<i32>} : memref<12x8x128xf32, #tpu.memory_space<vmem>>, vector<1x8x128xf32>,
    %83 = arith.mulf %20, %17 : vector<8x128xf32>
    %84 = arith.mulf %23, %29 : vector<8x128xf32>
    %85 = arith.addf %83, %84 : vector<8x128xf32>
    %c9 = arith.constant 9 : index
    %c0_38 = arith.constant 0 : index
    %c0_39 = arith.constant 0 : index
    %86 = vector.load %arg4[%c9, %c0_38, %c0_39] : memref<12x8x128xf32, #tpu.memory_space<vmem>>, vector<1x8x128xf32>
    %87 = vector.shape_cast %86 : vector<1x8x128xf32> to vector<8x128xf32>
    %88 = vector.shape_cast %85 : vector<8x128xf32> to vector<1x8x128xf32>
    tpu.vector_store %arg4[%c9, %c0_38, %c0_39], %88 {strides = array<i32>} : memref<12x8x128xf32, #tpu.memory_space<vmem>>, vector<1x8x128xf32>,
    %89 = arith.addf %24, %25 : vector<8x128xf32>
    %90 = arith.mulf %23, %89 : vector<8x128xf32>
    %91 = arith.subf %30, %90 : vector<8x128xf32>
    %c10 = arith.constant 10 : index
    %c0_40 = arith.constant 0 : index
    %c0_41 = arith.constant 0 : index
    %92 = vector.load %arg4[%c10, %c0_40, %c0_41] : memref<12x8x128xf32, #tpu.memory_space<vmem>>, vector<1x8x128xf32>
    %93 = vector.shape_cast %92 : vector<1x8x128xf32> to vector<8x128xf32>
    %94 = vector.shape_cast %91 : vector<8x128xf32> to vector<1x8x128xf32>
    tpu.vector_store %arg4[%c10, %c0_40, %c0_41], %94 {strides = array<i32>} : memref<12x8x128xf32, #tpu.memory_space<vmem>>, vector<1x8x128xf32>,
    %c2_42 = arith.constant 2 : index
    %c0_43 = arith.constant 0 : index
    %c0_44 = arith.constant 0 : index
    %95 = vector.load %arg3[%c2_42, %c0_43, %c0_44] : memref<3x8x128xf32, #tpu.memory_space<vmem>>, vector<1x8x128xf32>
    %96 = vector.shape_cast %95 : vector<1x8x128xf32> to vector<8x128xf32>
    %c11 = arith.constant 11 : index
    %c0_45 = arith.constant 0 : index
    %c0_46 = arith.constant 0 : index
    %97 = vector.load %arg4[%c11, %c0_45, %c0_46] : memref<12x8x128xf32, #tpu.memory_space<vmem>>, vector<1x8x128xf32>
    %98 = vector.shape_cast %97 : vector<1x8x128xf32> to vector<8x128xf32>
    %99 = vector.shape_cast %96 : vector<8x128xf32> to vector<1x8x128xf32>
    tpu.vector_store %arg4[%c11, %c0_45, %c0_46], %99 {strides = array<i32>} : memref<12x8x128xf32, #tpu.memory_space<vmem>>, vector<1x8x128xf32>,
    return
  }
  func.func @transform_0(%arg0: i32) -> (i32, i32, i32) {
    %c0_i32 = arith.constant 0 : i32
    %c0_i32_0 = arith.constant 0 : i32
    %c0_i32_1 = arith.constant 0 : i32
    return %c0_i32, %arg0, %c0_i32_0 : i32, i32, i32
  }
  func.func @transform_1(%arg0: i32) -> (i32, i32, i32) {
    %c0_i32 = arith.constant 0 : i32
    %c0_i32_0 = arith.constant 0 : i32
    %c0_i32_1 = arith.constant 0 : i32
    return %c0_i32, %arg0, %c0_i32_0 : i32, i32, i32
  }
  func.func @transform_2(%arg0: i32) -> (i32, i32, i32) {
    %c0_i32 = arith.constant 0 : i32
    %c0_i32_0 = arith.constant 0 : i32
    %c0_i32_1 = arith.constant 0 : i32
    return %c0_i32, %arg0, %c0_i32_0 : i32, i32, i32
  }
  func.func @transform_3(%arg0: i32) -> (i32, i32, i32) {
    %c0_i32 = arith.constant 0 : i32
    %c0_i32_0 = arith.constant 0 : i32
    %c0_i32_1 = arith.constant 0 : i32
    return %c0_i32, %arg0, %c0_i32_0 : i32, i32, i32
  }
}

</mosaic_0001>

<bundles_post_ra>
// kernel: tpu_custom_call.1
= control target key start
LH: loop header
LB: loop body
LE: loop exit
PB: predicated region body
PF: predicated region fallthrough
CT: control target
= control target key end

     0   :  { %8 = vsyncpa [#allocation3], 0  ;;  %s743_s0 = inlined_call_operand.hbm [shape: f32[3,8,128], index: 0, kind: input, shape index: {}]   ;;  %s744_s1 = inlined_call_operand.hbm [shape: f32[1,8,128], index: 1, kind: input, shape index: {}]   ;;  %s745_s2 = inlined_call_operand.hbm [shape: f32[3,8,128], index: 2, kind: input, shape index: {}]   ;;  %s746_s3 = inlined_call_operand.hbm [shape: f32[12,8,128], index: 3, kind: output, shape index: {}]  }
   0x1   :  { %9 = vsyncpa [#allocation6], 0  ;;  %s29_s14 = sshll.u32 %s744_s1, 4  ;;  %s30_s14 = int_to_ptr.hbm [resolvable:$true] %s29_s14 }
   0x2   :  { %10 = vsyncpa [#allocation4], 0  ;;  %s611_s15 = smov [#allocation5]   ;;  %s15_s19 = sshll.u32 %s743_s0, 4  ;;  %s16_s19 = int_to_ptr.hbm [resolvable:$true] %s15_s19 }
   0x3   :  { %s31_s16 = sshll.u32 %s611_s15, 4  ;;  %s612_s20 = smov [#allocation2]   ;;  %s32_s16 = int_to_ptr.vmem [resolvable:$true] %s31_s16 }
   0x4   :  { %34 = dma.hbm_to_vmem [thread:$0]  %s30_s14, 128, %s32_s16, [#allocation6]  }
   0x5   :  { %s17_s21 = sshll.u32 %s612_s20, 4  ;;  %s613_s22 = smov 128   ;;  %s18_s21 = int_to_ptr.vmem [resolvable:$true] %s17_s21 }
   0x6   :  { %s614_s23 = smov 8   ;;  %s39_s25 = sshll.u32 %s745_s2, 4  ;;  %s40_s25 = int_to_ptr.hbm [resolvable:$true] %s39_s25 }
   0x7   :  { %23 = dma.hbm_to_vmem [thread:$0]  %s16_s19, 384, %s18_s21, [#allocation3], %s613_s22, %s613_s22, %s614_s23  }
   0x8   :  { %s615_s26 = smov [#allocation7]  }
   0x9   :  { %s41_s27 = sshll.u32 %s615_s26, 4  ;;  %s42_s27 = int_to_ptr.vmem [resolvable:$true] %s41_s27 }
   0xa   :  { %47 = dma.hbm_to_vmem [thread:$0]  %s40_s25, 384, %s42_s27, [#allocation6], %s613_s22, %s613_s22, %s614_s23  }
   0xb   :  { %605 = dma.done.wait [#allocation3], 384  }
   0xc   :  { %606 = vsyncadd [#allocation3], 4294966912 }
   0xd   :  { %607 = dma.done.wait [#allocation6], 512  }
   0xe   :  { %608 = vsyncadd [#allocation6], 4294966784  ;;  %v659_v0 = vld [vmem:[#allocation2] sm:$0xff]  ;;  %v661_v1 = vld [vmem:[#allocation2 + $0x8] sm:$0xff]  ;;  %v616_v20 = vmov 683565275  }
   0xf   :  { %v663_v2 = vld [vmem:[#allocation5] sm:$0xff]  ;;  %v66_v4 = vmul.f32 %v659_v0, %v659_v0  ;;  %v67_v5 = vmul.f32 %v661_v1, %v661_v1  ;;  %v670_v7 = vld [vmem:[#allocation2 + $0x10] sm:$0xff]  ;;  %v617_v22 = vmov 2475754826   ;;  %v618_v24 = vmov 2131351028  }
  0x10   :  { %v104_v3 = vand.u32 2139095040, %v663_v2  ;;  %v101_v8 = vand.u32 2147483647, %v663_v2  ;;  %v69_v11 = vmul.f32 %v670_v7, %v670_v7  ;;  %v619_v26 = vmov 2102212464   ;;  %s623_s0 = smov [#allocation8]  }
  0x11   :  { %v68_v10 = vadd.f32 %v67_v5, %v66_v4  ;;  %v620_v31 = vmov 920167782   ;;  %v621_v34 = vmov 1326507024   ;;  %vm103_vm14 = vcmp.lt.s32.totalorder %v663_v2, 0  ;;  %s470_s2 = sshll.u32 %s623_s0, 4  ;;  %s471_s2 = int_to_ptr.vmem [resolvable:$true] %s470_s2 }
  0x12   :  { %v105_v6 = vshrl.u32 %v104_v3, 23  ;;  %v108_v13 = vand.u32 8388607, %v101_v8  ;;  %vm724_vm15 = vcmp.le.f32.partialorder %v101_v8, 0.7853982  ;;  %s472_s30 = sshll.u32 %s746_s3, 4  ;;  %s473_s30 = int_to_ptr.hbm [resolvable:$true] %s472_s30 }
  0x13   :  { %v677_v15 = vadd.f32 %v69_v11, %v68_v10 }
  0x14   :  { %v486_v9 = vadd.s32 4294967169, %v105_v6  ;;  %v109_v17 = vor.u32 8388608, %v108_v13 }
  0x15   :  { %505 = vrsqrt.f32 %v677_v15  ;;  %vm78_vm10 = vcmp.eq.f32.partialorder %v677_v15, inf  ;;  %vm80_vm11 = vcmp.eq.f32.partialorder %v677_v15, 0.0 }
  0x16   :  { %v111_v12 = vadd.s32 1, %v486_v9  ;;  %v683_v38 = vshll.u32 %v109_v17, 8  ;;  %v622_v17 = vmov 0  }
  0x18   :  { %vm112_vm0 = vcmp.gt.s32.totalorder %v111_v12, 0  ;;  %v150_v48 = vand.u32 65535, %v683_v38  ;;  %v151_v51 = vshrl.u32 %v683_v38, 16 }
  0x19   :  { %v113_v14 = vsel %vm112_vm0, %v111_v12, 0 }
  0x1a   :  { %v115_v16 = vand.u32 31, %v113_v14  ;;  %v679_v18 = vshrl.u32 %v113_v14, 5 }
  0x1b   :  { %v506_v45 = vpop.eup %505 }
  0x1c   :  { %v116_v19 = vsub.s32 32, %v115_v16  ;;  %v118_v21 = vshll.u32 %v616_v20, %v115_v16  ;;  %v121_v23 = vshll.u32 %v617_v22, %v115_v16  ;;  %v124_v25 = vshll.u32 %v618_v24, %v115_v16 }
  0x1d   :  { %v127_v27 = vshll.u32 %v619_v26, %v115_v16  ;;  %v130_v33 = vshll.u32 %v620_v31, %v115_v16  ;;  %vm133_vm1 = vcmp.lt.s32.totalorder %v679_v18, 1  ;;  %vm134_vm2 = vcmp.lt.s32.totalorder %v679_v18, 2 }
  0x1e   :  { %v119_v28 = vshrl.u32 %v617_v22, %v116_v19  ;;  %v122_v29 = vshrl.u32 %v618_v24, %v116_v19  ;;  %v125_v30 = vshrl.u32 %v619_v26, %v116_v19  ;;  %v128_v32 = vshrl.u32 %v620_v31, %v116_v19 }
  0x1f   :  { %v131_v35 = vshrl.u32 %v621_v34, %v116_v19  ;;  %vm135_vm3 = vcmp.lt.s32.totalorder %v679_v18, 3  ;;  %vm136_vm4 = vcmp.lt.s32.totalorder %v679_v18, 4  ;;  %v72_v57 = vmul.f32 %v506_v45, %v677_v15 }
  0x20   :  { %v120_v36 = vor.u32 %v119_v28, %v118_v21  ;;  %v123_v37 = vor.u32 %v122_v29, %v121_v23  ;;  %v126_v39 = vor.u32 %v125_v30, %v124_v25  ;;  %v129_v40 = vor.u32 %v128_v32, %v127_v27 }
  0x21   :  { %v132_v41 = vor.u32 %v131_v35, %v130_v33  ;;  %v73_v9 = vmul.f32 %v506_v45, %v72_v57  ;;  %v117_v13 = vshrl.u32 %v616_v20, %v116_v19 }
  0x22   :  { %v141_v42 = vsel %vm133_vm1, %v120_v36, %v123_v37  ;;  %v142_v43 = vsel %vm136_vm4, %v129_v40, 920167782  ;;  %v145_v44 = vsel %vm133_vm1, %v123_v37, %v126_v39  ;;  %v138_v14 = vsel %vm136_vm4, %v126_v39, 2102212464 }
  0x23   :  { %v143_v46 = vsel %vm135_vm3, %v126_v39, %v142_v43  ;;  %v146_v47 = vsel %vm136_vm4, %v132_v41, 1326507024  ;;  %v74_v24 = vmul.f32 0.5, %v73_v9  ;;  %v137_v19 = vsel %vm133_vm1, %v117_v13, %v120_v36 }
  0x24   :  { %v144_v49 = vsel %vm134_vm2, %v141_v42, %v143_v46  ;;  %v147_v50 = vsel %vm135_vm3, %v129_v40, %v146_v47  ;;  %v139_v20 = vsel %vm135_vm3, %v123_v37, %v138_v14 }
  0x25   :  { %v148_v52 = vsel %vm134_vm2, %v145_v44, %v147_v50  ;;  %v174_v53 = vand.u32 65535, %v144_v49  ;;  %v175_v54 = vshrl.u32 %v144_v49, 16  ;;  %v75_v35 = vsub.f32 1.5, %v74_v24 }
  0x26   :  { %v152_v55 = vand.u32 65535, %v148_v52  ;;  %v153_v56 = vshrl.u32 %v148_v52, 16  ;;  %v140_v40 = vsel %vm134_vm2, %v137_v19, %v139_v20  ;;  %v81_v50 = vand.u32 2147483648, %v677_v15 }
  0x27   :  { %v177_v58 = vmul.u32 %v175_v54, %v150_v48  ;;  %v178_v62 = vmul.u32 %v174_v53, %v151_v51  ;;  %v176_v63 = vmul.u32 %v174_v53, %v150_v48  ;;  %v179_v11 = vmul.u32 %v175_v54, %v151_v51 }
  0x28   :  { %v154_v59 = vmul.u32 %v152_v55, %v150_v48  ;;  %v155_v60 = vmul.u32 %v153_v56, %v150_v48  ;;  %v156_v61 = vmul.u32 %v152_v55, %v151_v51  ;;  %v157_v3 = vmul.u32 %v153_v56, %v151_v51 }
  0x29   :  { %v180_v6 = vshll.u32 %v177_v58, 16  ;;  %v182_v12 = vshll.u32 %v178_v62, 16  ;;  %v181_v29 = vshrl.u32 %v177_v58, 16  ;;  %v183_v33 = vshrl.u32 %v178_v62, 16 }
  0x2a   :  { %v158_v4 = vshll.u32 %v155_v60, 16  ;;  %v160_v5 = vshll.u32 %v156_v61, 16  ;;  %v159_v16 = vshrl.u32 %v155_v60, 16  ;;  %v161_v25 = vshrl.u32 %v156_v61, 16 }
  0x2b   :  { %vm184_vm7 = vc.u32 %v176_v63, %v180_v6  ;;  %v186_v23 = vadd.s32 %v180_v6, %v176_v63  ;;  %v76_v44 = vmul.f32 %v506_v45, %v75_v35  ;;  %v194_v46 = vmul.u32 %v683_v38, %v140_v40 }
  0x2c   :  { %vm162_vm5 = vc.u32 %v154_v59, %v158_v4  ;;  %v164_v10 = vadd.s32 %v158_v4, %v154_v59  ;;  %v185_v27 = vsel %vm184_vm7, 1, %v622_v17 }
  0x2d   :  { %v163_v21 = vsel %vm162_vm5, 1, %v622_v17  ;;  %v187_v30 = vadd.s32 %v185_v27, %v179_v11  ;;  %vm188_vm8 = vc.u32 %v186_v23, %v182_v12  ;;  %v190_v39 = vadd.s32 %v186_v23, %v182_v12  ;;  %v448_v27 = vld [vmem:[#allocation7 + $0x8] sm:$0xff] }
  0x2e   :  { %v165_v22 = vadd.s32 %v163_v21, %v157_v3  ;;  %vm166_vm6 = vc.u32 %v164_v10, %v160_v5  ;;  %v189_v31 = vsel %vm188_vm8, 1, %v622_v17  ;;  %v77_v37 = vmul.f32 %v76_v44, %v677_v15  ;;  %450 = vst [vmem:[#allocation8 + $0x38] sm:$0xff] %v448_v27 }
  0x2f   :  { %v167_v26 = vsel %vm166_vm6, 1, %v622_v17  ;;  %v191_v34 = vadd.s32 %v189_v31, %v187_v30  ;;  %v463_v31 = vld [vmem:[#allocation7 + $0x10] sm:$0xff] }
  0x30   :  { %v169_v28 = vadd.s32 %v167_v26, %v165_v22  ;;  %v79_v18 = vsel %vm78_vm10, %v677_v15, %v77_v37  ;;  %v431_v22 = vld [vmem:[#allocation7] sm:$0xff]  ;;  %465 = vst [vmem:[#allocation8 + $0x58] sm:$0xff] %v463_v31  ;;  %vm244_vm10 = vweird.f32 %v663_v2 }
  0x31   :  { %v192_v42 = vadd.s32 %v191_v34, %v181_v29  ;;  %v82_v45 = vsel %vm80_vm11, %v81_v50, %v79_v18  ;;  %433 = vst [vmem:[#allocation8 + $0x18] sm:$0xff] %v431_v22 }
  0x32   :  { %v170_v32 = vadd.s32 %v169_v28, %v159_v16  ;;  %v83_v38 = vadd.f32 1e-08, %v82_v45 }
  0x33   :  { %v193_v43 = vadd.s32 %v192_v42, %v183_v33 }
  0x34   :  { %v171_v41 = vadd.s32 %v170_v32, %v161_v25  ;;  %507 = vrcp.f32 %v83_v38  ;;  %vm89_vm0 = vweird.f32 %v83_v38  ;;  %v95_v24 = vand.u32 2147483648, %v83_v38 }
  0x35   :  { %v197_v36 = vadd.s32 1, %v193_v43  ;;  %v93_v29 = vand.u32 2147483647, %v83_v38 }
  0x36   :  { %vm196_vm9 = vc.u32 %v171_v41, %v190_v39  ;;  %v195_v58 = vadd.s32 %v190_v39, %v171_v41  ;;  %v96_v32 = vor.u32 1.1754944e-38, %v95_v24 }
  0x37   :  { %v198_v47 = vsel %vm196_vm9, %v197_v36, %v193_v43  ;;  %vm94_vm3 = vcmp.eq.f32.partialorder %v93_v29, 8.507059e+37 }
  0x38   :  { %v199_v48 = vadd.s32 %v198_v47, %v194_v46 }
  0x3a   :  { %v200_v49 = vadd.s32 536870912, %v199_v48  ;;  %v508_v63 = vpop.eup %507 }
  0x3b   :  { %v85_v4 = vmul.f32 %v508_v63, %v83_v38  ;;  %vm90_vm1 = vweird.f32 %v508_v63 }
  0x3c   :  { %v201_v51 = vshrl.u32 %v200_v49, 30  ;;  %vm91_vm2 = vmor %vm89_vm0, %vm90_vm1 }
  0x3d   :  { %v86_v11 = vsub.f32 1.0, %v85_v4 }
  0x3e   :  { %v202_v52 = vshll.u32 %v201_v51, 30  ;;  %v225_v14 = vsub.s32 4, %v201_v51 }
  0x3f   :  { %v87_v16 = vmul.f32 %v508_v63, %v86_v11 }
  0x40   :  { %v203_v53 = vsub.s32 %v199_v48, %v202_v52  ;;  %v226_v25 = vsel %vm103_vm14, %v225_v14, %v201_v51 }
  0x41   :  { %v88_v28 = vadd.f32 %v508_v63, %v87_v16  ;;  %v228_v8 = vsel %vm724_vm15, 0, %v226_v25 }
  0x42   :  { %vm204_vm12 = vcmp.lt.s32.totalorder %v203_v53, 0  ;;  %v205_v54 = vsub.s32 0, %v203_v53  ;;  %v245_v39 = vadd.s32 3, %v228_v8  ;;  %v400_v46 = vand.u32 3, %v228_v8 }
  0x43   :  { %v92_v33 = vsel %vm91_vm2, %v508_v63, %v88_v28 }
  0x44   :  { %v206_v55 = vsel %vm204_vm12, %v205_v54, %v203_v53  ;;  %v97_v42 = vsel %vm94_vm3, %v96_v32, %v92_v33  ;;  %v246_v36 = vand.u32 3, %v245_v39  ;;  %vm405_vm4 = vcmp.eq.s32.totalorder %v400_v46, 2 }
  0x45   :  { %v207_v56 = vclz %v206_v55  ;;  %v99_v47 = vmul.f32 %v97_v42, %v661_v1  ;;  %v100_v37 = vmul.f32 %v97_v42, %v670_v7  ;;  %v98_v50 = vmul.f32 %v97_v42, %v659_v0 }
  0x46   :  { %vm251_vm5 = vcmp.eq.s32.totalorder %v246_v36, 2  ;;  %vm401_vm6 = vcmp.lt.s32.totalorder %v400_v46, 2  ;;  %vm402_vm7 = vcmp.eq.s32.totalorder %v400_v46, 0  ;;  %vm248_vm8 = vcmp.eq.s32.totalorder %v246_v36, 0 }
  0x47   :  { %v487_v57 = vadd.s32 4294967294, %v207_v56  ;;  %v413_v38 = vmul.f32 %v100_v37, %v100_v37  ;;  %v411_v54 = vmul.f32 %v98_v50, %v98_v50  ;;  %vm247_vm9 = vcmp.lt.s32.totalorder %v246_v36, 2 }
  0x49   :  { %vm488_vm13 = vcmp.lt.s32.totalorder %v487_v57, 0 }
  0x4a   :  { %v210_v59 = vsel %vm488_vm13, 0, %v487_v57 }
  0x4b   :  { %v211_v60 = vsub.s32 32, %v210_v59  ;;  %v212_v61 = vshll.u32 %v203_v53, %v210_v59  ;;  %v215_v62 = vsub.s32 4294967266, %v210_v59  ;;  %v412_v53 = vmul.f32 %v99_v47, %v99_v47 }
  0x4d   :  { %v213_v3 = vshrl.u32 %v195_v58, %v211_v60  ;;  %v216_v15 = vadd.s32 127, %v215_v62  ;;  %v417_v0 = vadd.f32 %v413_v38, %v412_v53  ;;  %v414_v58 = vmul.f32 %v99_v47, %v98_v50 }
  0x4e   :  { %v437_v62 = vadd.f32 %v413_v38, %v411_v54 }
  0x4f   :  { %v214_v5 = vor.u32 %v213_v3, %v212_v61  ;;  %v217_v6 = vshll.u32 %v216_v15, 23  ;;  %v415_v61 = vmul.f32 %v100_v37, %v98_v50  ;;  %v416_v15 = vmul.f32 %v100_v37, %v99_v47 }
  0x51   :  { %v218_v9 = vor.u32 4788187, %v217_v6  ;;  %v221_v10 = vcvt.s32.f32 %v214_v5 }
  0x53   :  { %v219_v12 = vand.u32 2147483647, %v218_v9  ;;  %v457_v9 = vadd.f32 %v412_v53, %v411_v54 }
  0x55   :  { %v222_v13 = vmul.f32 %v221_v10, %v219_v12 }
  0x57   :  { %v223_v21 = vxor.u32 2147483648, %v222_v13 }
  0x59   :  { %v224_v23 = vsel %vm103_vm14, %v223_v21, %v222_v13 }
  0x5a   :  { %v227_v26 = vsel %vm724_vm15, %v663_v2, %v224_v23 }
  0x5b   :  { %v229_v30 = vmul.f32 %v227_v26, %v227_v26 }
  0x5d   :  { %v230_v19 = vmul.f32 -0.001358992, %v229_v30  ;;  %v237_v20 = vmul.f32 -0.00019511016, %v229_v30 }
  0x5f   :  { %v231_v34 = vadd.f32 0.041655596, %v230_v19  ;;  %v238_v35 = vadd.f32 0.008332121, %v237_v20 }
  0x61   :  { %v232_v40 = vmul.f32 %v231_v34, %v229_v30  ;;  %v239_v41 = vmul.f32 %v238_v35, %v229_v30 }
  0x63   :  { %v233_v43 = vadd.f32 -0.4999988, %v232_v40  ;;  %v240_v44 = vadd.f32 -0.16666654, %v239_v41 }
  0x65   :  { %v234_v48 = vmul.f32 %v233_v43, %v229_v30  ;;  %v241_v49 = vmul.f32 %v240_v44, %v229_v30 }
  0x67   :  { %v235_v18 = vadd.f32 1.0, %v234_v48  ;;  %v242_v51 = vadd.f32 1.0, %v241_v49 }
  0x69   :  { %v243_v52 = vmul.f32 %v242_v51, %v227_v26  ;;  %v252_v45 = vxor.u32 2147483648, %v235_v18 }
  0x6b   :  { %v249_v55 = vxor.u32 2147483648, %v243_v52  ;;  %v407_v1 = vsel %vm405_vm4, %v252_v45, %v243_v52  ;;  %v253_v7 = vsel %vm251_vm5, %v252_v45, %v243_v52 }
  0x6d   :  { %v404_v56 = vsel %vm402_vm7, %v235_v18, %v249_v55  ;;  %v250_v57 = vsel %vm248_vm8, %v235_v18, %v249_v55 }
  0x6e   :  { %v408_v59 = vsel %vm401_vm6, %v404_v56, %v407_v1  ;;  %v254_v60 = vsel %vm247_vm9, %v250_v57, %v253_v7 }
  0x6f   :  { %v409_v63 = vsel %vm244_vm10, nan, %v408_v59  ;;  %v255_v3 = vsel %vm244_vm10, nan, %v254_v60 }
  0x70   :  { %v410_v4 = vsub.f32 1.0, %v409_v63  ;;  %v422_v5 = vmul.f32 %v255_v3, %v100_v37  ;;  %v426_v6 = vmul.f32 %v255_v3, %v99_v47  ;;  %v443_v14 = vmul.f32 %v255_v3, %v98_v50 }
  0x72   :  { %v418_v10 = vmul.f32 %v417_v0, %v410_v4  ;;  %v421_v11 = vmul.f32 %v414_v58, %v410_v4  ;;  %v427_v12 = vmul.f32 %v415_v61, %v410_v4  ;;  %v438_v13 = vmul.f32 %v437_v62, %v410_v4 }
  0x73   :  { %v442_v2 = vmul.f32 %v416_v15, %v410_v4  ;;  %v458_v24 = vmul.f32 %v457_v9, %v410_v4 }
  0x74   :  { %v419_v16 = vsub.f32 1.0, %v418_v10  ;;  %v423_v17 = vsub.f32 %v421_v11, %v422_v5  ;;  %v428_v21 = vadd.f32 %v427_v12, %v426_v6  ;;  %v434_v22 = vadd.f32 %v422_v5, %v421_v11 }
  0x75   :  { %v439_v23 = vsub.f32 1.0, %v438_v13  ;;  %v444_v25 = vsub.f32 %v442_v2, %v443_v14  ;;  %v451_v26 = vsub.f32 %v427_v12, %v426_v6  ;;  %v454_v27 = vadd.f32 %v443_v14, %v442_v2 }
  0x76   :  { %420 = vst [vmem:[#allocation8] sm:$0xff] %v419_v16  ;;  %v459_v28 = vsub.f32 1.0, %v458_v24 }
  0x77   :  { %425 = vst [vmem:[#allocation8 + $0x8] sm:$0xff] %v423_v17 }
  0x78   :  { %430 = vst [vmem:[#allocation8 + $0x10] sm:$0xff] %v428_v21 }
  0x79   :  { %436 = vst [vmem:[#allocation8 + $0x20] sm:$0xff] %v434_v22 }
  0x7a   :  { %441 = vst [vmem:[#allocation8 + $0x28] sm:$0xff] %v439_v23 }
  0x7b   :  { %446 = vst [vmem:[#allocation8 + $0x30] sm:$0xff] %v444_v25 }
  0x7c   :  { %453 = vst [vmem:[#allocation8 + $0x40] sm:$0xff] %v451_v26 }
  0x7d   :  { %456 = vst [vmem:[#allocation8 + $0x48] sm:$0xff] %v454_v27 }
  0x7e   :  { %461 = vst [vmem:[#allocation8 + $0x50] sm:$0xff] %v459_v28 }
  0x7f   :  { %478 = dma.vmem_to_hbm [thread:$0]  %s471_s2, 1536, %s473_s30, [#allocation4], %s613_s22, %s613_s22, %s614_s23  }
  0x80   :  { %609 = dma.done.wait [#allocation4], 1536  }
  0x81   :  { %610 = vsyncadd [#allocation4], 4294965760 }
  0x82   :  { %483 = vsyncpa [#allocation3], 1 }
  0x83   :  { %484 = vsyncpa [#allocation6], 1 }
  0x84   :  { %485 = vsyncpa [#allocation4], 1 }

</bundles_post_ra>
